<compile_context>
chip_gen: v7x
topology: tpu7x:2x2x1
jax: 0.10.0
libtpu: 0.0.40
codegen_flags: <defaults>
</compile_context>

<pallas_src>
import math
import functools

import jax
import jax.numpy as jnp
from jax.experimental import pallas as pl
from jax.experimental.pallas import tpu as pltpu


def _stochastic_time_embed_kernel(tm_ref, tbl_ref, w1_ref, w2_ref, bias_ref,
                                  out_ref, *, dim, odd):
    # --- unpack timesteps / mask (packed as lanes 0/1 of one stream) ---
    tm = tm_ref[...]                                   # (tn, 2) f32
    t = tm[:, 0:1]                                     # (tn, 1)
    use_tok = tm[:, 1:2] > 0.5                         # (tn, 1) bool

    # --- sinusoidal embedding, flip_sin_to_cos=True  ->  [cos | sin] ---
    # Single EUP pass: cos(t*f) for the first half, cos(t*f - pi/2) = sin(t*f)
    # for the second half. freqs_full / phase are precomputed in the wrapper.
    args = t * tbl_ref[0:1, :] - tbl_ref[1:2, :]       # (tn, dim) f32
    emb = jnp.cos(args)
    if odd:                                            # odd dim: zero-pad last lane
        lane = jax.lax.broadcasted_iota(jnp.int32, emb.shape, 1)
        emb = jnp.where(lane < dim - 1, emb, 0.0)

    # --- StochasticUnknownTimesteps: replace rows where mask is set ---
    emb = jnp.where(use_tok, tbl_ref[2:3, :], emb)     # (tn, dim) f32

    # --- TimestepEmbedding: Linear -> SiLU -> Linear (bf16 MXU, f32 accum) ---
    h = jnp.dot(emb.astype(w1_ref.dtype), w1_ref[...],
                preferred_element_type=jnp.float32) + bias_ref[0:1, :]
    h = h * jax.nn.sigmoid(h)                          # SiLU in f32
    o = jnp.dot(h.astype(w2_ref.dtype), w2_ref[...],
                preferred_element_type=jnp.float32) + bias_ref[1:2, :]
    out_ref[...] = o.astype(out_ref.dtype)


def stochastic_time_embedding(timesteps, mask, params, *, dim, time_embed_dim,
                              p=1.0, max_period=10000.0,
                              downscale_freq_shift=0.0, tn=256, key=None,
                              mxu_dtype=jnp.bfloat16, out_dtype=jnp.float32):
    """Forward pass of StochasticTimeEmbedding.

    timesteps: 1-D (N,) or 2-D (B, T) int/float array.
    mask:      same leading shape (bool) or None. If None, a Bernoulli(p) mask
               is drawn from `key` (the training / p==1.0 / mask-is-None branch).
    """
    assert timesteps.ndim in (1, 2), "Timesteps should be a 1D or 2D tensor"
    H = time_embed_dim
    half = dim // 2

    tok = params.get("unknown_token")
    w1, b1, w2, b2 = params["w1"], params["b1"], params["w2"], params["b2"]

    lead_shape = timesteps.shape
    # NOTE: int->f32 cast is exact for timesteps < 2^24 (true for diffusion steps).
    t_flat = timesteps.reshape(-1).astype(jnp.float32)
    n = t_flat.shape[0]

    if p == 0.0 or tok is None:
        # module returns plain t_emb when p == 0 (no unknown token)
        m_flat = jnp.zeros((n,), jnp.float32)
        tok_row = jnp.zeros((dim,), jnp.float32)
    else:
        tok_row = tok.reshape(-1).astype(jnp.float32)
        if mask is None:
            if key is None:
                raise ValueError("mask is None: pass `key=` for the Bernoulli(p) draw")
            m_flat = (jax.random.uniform(key, (n,)) < p).astype(jnp.float32)
        else:
            m_flat = mask.reshape(-1).astype(jnp.float32)

    # Pack t and mask into one lane-packed stream -> single small DMA per step.
    tm = jnp.stack([t_flat, m_flat], axis=-1)          # (N, 2) f32

    # Hoisted constant table (resident in VMEM, constant index_map):
    #   row 0: freqs_full[j] = freqs[j % half]
    #   row 1: phase[j]      = 0 (cos half) / pi/2 (sin half)
    #   row 2: unknown_token
    exponent = -math.log(max_period) * jnp.arange(half, dtype=jnp.float32)
    freqs = jnp.exp(exponent / (half - downscale_freq_shift))
    idx = jnp.arange(dim)
    freqs_full = freqs[idx % half]
    phase = jnp.where(idx < half, 0.0, math.pi / 2.0).astype(jnp.float32)
    tbl = jnp.stack([freqs_full, phase, tok_row], axis=0)      # (3, dim) f32

    biases = jnp.concatenate([b1.reshape(1, H), b2.reshape(1, H)],
                             axis=0).astype(jnp.float32)       # (2, H) f32

    # Row tiling: big tiles (default 256), pad N instead of asserting.
    tn = max(8, (int(tn) // 8) * 8)
    tn_eff = min(tn, -(-n // 8) * 8)                   # don't exceed (padded) N
    n_pad = -(-n // tn_eff) * tn_eff
    if n_pad != n:
        tm = jnp.pad(tm, ((0, n_pad - n), (0, 0)))

    kernel = functools.partial(_stochastic_time_embed_kernel,
                               dim=dim, odd=(dim % 2 == 1))

    out = pl.pallas_call(
        kernel,
        out_shape=jax.ShapeDtypeStruct((n_pad, H), out_dtype),
        grid_spec=pltpu.PrefetchScalarGridSpec(
            num_scalar_prefetch=0,
            grid=(n_pad // tn_eff,),
            in_specs=[
                pl.BlockSpec((tn_eff, 2), lambda i: (i, 0)),   # packed t / mask
                pl.BlockSpec((3, dim), lambda i: (0, 0)),      # freqs/phase/token
                pl.BlockSpec((dim, H), lambda i: (0, 0)),      # W1 (bf16)
                pl.BlockSpec((H, H), lambda i: (0, 0)),        # W2 (bf16)
                pl.BlockSpec((2, H), lambda i: (0, 0)),        # b1 / b2 (f32)
            ],
            out_specs=pl.BlockSpec((tn_eff, H), lambda i: (i, 0)),
        ),
        compiler_params=pltpu.CompilerParams(
            dimension_semantics=("parallel",)),
    )(tm, tbl, w1.astype(mxu_dtype), w2.astype(mxu_dtype), biases)

    return out[:n].reshape(lead_shape + (H,))


def _reference(timesteps, mask, params, *, dim, max_period=10000.0,
               downscale_freq_shift=0.0, mxu_dtype=jnp.float32):
    """Pure-JAX reference mirroring the PyTorch module (provided-mask branch).
    `mxu_dtype` lets us mirror the kernel's bf16 matmul operands for a tight check."""
    half = dim // 2
    exponent = -math.log(max_period) * jnp.arange(half, dtype=jnp.float32)
    freqs = jnp.exp(exponent / (half - downscale_freq_shift))
    emb = timesteps.astype(jnp.float32)[..., None] * freqs
    emb = jnp.concatenate([jnp.sin(emb), jnp.cos(emb)], axis=-1)
    emb = jnp.concatenate([emb[..., half:], emb[..., :half]], axis=-1)  # flip
    emb = jnp.where(mask[..., None], params["unknown_token"][0], emb)
    h = jnp.dot(emb.astype(mxu_dtype), params["w1"].astype(mxu_dtype),
                preferred_element_type=jnp.float32) + params["b1"][0]
    h = h * jax.nn.sigmoid(h)
    return jnp.dot(h.astype(mxu_dtype), params["w2"].astype(mxu_dtype),
                   preferred_element_type=jnp.float32) + params["b2"][0]


if __name__ == "__main__":
    dim = 64              # num_channels of the sinusoidal embedding
    time_embed_dim = 128  # hidden / output width of TimestepEmbedding
    B, T = 2, 8           # 2-D timesteps (batch, frames); N = 16

    key = jax.random.PRNGKey(0)
    k_tok, k_w1, k_b1, k_w2, k_b2, k_t, k_m, k_rand = jax.random.split(key, 8)

    # deterministic synthetic parameters (shapes from the module __init__)
    params = {
        "unknown_token": jax.random.normal(k_tok, (1, dim), jnp.float32),
        "w1": jax.random.normal(k_w1, (dim, time_embed_dim), jnp.float32)
              * (1.0 / math.sqrt(dim)),
        "b1": jax.random.normal(k_b1, (1, time_embed_dim), jnp.float32) * 0.01,
        "w2": jax.random.normal(k_w2, (time_embed_dim, time_embed_dim),
                                jnp.float32) * (1.0 / math.sqrt(time_embed_dim)),
        "b2": jax.random.normal(k_b2, (1, time_embed_dim), jnp.float32) * 0.01,
    }

    timesteps = jax.random.randint(k_t, (B, T), 0, 1000, dtype=jnp.int32)
    # eval-mode branch with an explicit mask (deterministic)
    mask = jax.random.bernoulli(k_m, 0.5, (B, T))

    out = stochastic_time_embedding(timesteps, mask, params,
                                    dim=dim, time_embed_dim=time_embed_dim, p=0.5)
    out = jax.block_until_ready(out)
    assert out.shape == (B, T, time_embed_dim)

    # Check against a reference that mirrors the kernel's bf16 MXU operands
    # (small slack for the cos(x - pi/2) == sin(x) evaluation path).
    ref_bf16 = _reference(timesteps, mask, params, dim=dim,
                          mxu_dtype=jnp.bfloat16)
    assert jnp.allclose(out, ref_bf16, rtol=5e-3, atol=5e-3), \
        "mismatch vs bf16-operand reference"

    # Looser check against the pure-f32 module semantics (bf16 quantization slack).
    ref_f32 = _reference(timesteps, mask, params, dim=dim, mxu_dtype=jnp.float32)
    assert jnp.allclose(out, ref_f32, rtol=5e-2, atol=5e-2), \
        "mismatch vs f32 reference"

    # Exercise the 1-D / mask-is-None (Bernoulli draw) branch: shape check only.
    t1d = jax.random.randint(k_t, (12,), 0, 1000, dtype=jnp.int32)
    out1d = stochastic_time_embedding(t1d, None, params, dim=dim,
                                      time_embed_dim=time_embed_dim,
                                      p=1.0, key=k_rand)
    out1d = jax.block_until_ready(out1d)
    assert out1d.shape == (12, time_embed_dim)

    print("KERNEL_OK")
</pallas_src>

<mosaic_0001>
module attributes {stable_mosaic.version = 11 : i64} {
  func.func @_stochastic_time_embed_kernel(%arg0: i32, %arg1: memref<16x2xf32, #tpu.memory_space<vmem>>, %arg2: memref<3x64xf32, #tpu.memory_space<vmem>>, %arg3: memref<64x128xbf16, #tpu.memory_space<vmem>>, %arg4: memref<128x128xbf16, #tpu.memory_space<vmem>>, %arg5: memref<2x128xf32, #tpu.memory_space<vmem>>, %arg6: memref<16x128xf32, #tpu.memory_space<vmem>>) attributes {dimension_semantics = [#tpu.dimension_semantics<parallel>], iteration_bounds = array<i64: 1>, scalar_prefetch = 0 : i64, scratch_operands = 0 : i64, tpu.core_type = #tpu.core_type<tc>, window_params = [{transform_indices = @transform_0, window_bounds = array<i64: 16, 2>}, {pipeline_mode = #tpu.pipeline_mode<synchronous>, transform_indices = @transform_1, window_bounds = array<i64: 3, 64>}, {pipeline_mode = #tpu.pipeline_mode<synchronous>, transform_indices = @transform_2, window_bounds = array<i64: 64, 128>}, {pipeline_mode = #tpu.pipeline_mode<synchronous>, transform_indices = @transform_3, window_bounds = array<i64: 128, 128>}, {pipeline_mode = #tpu.pipeline_mode<synchronous>, transform_indices = @transform_4, window_bounds = array<i64: 2, 128>}, {transform_indices = @transform_5, window_bounds = array<i64: 16, 128>}]} {
    %c0 = arith.constant 0 : index
    %c0_0 = arith.constant 0 : index
    %0 = vector.load %arg1[%c0, %c0_0] : memref<16x2xf32, #tpu.memory_space<vmem>>, vector<16x2xf32>
    %1 = vector.extract_strided_slice %0 {offsets = [0, 0], sizes = [16, 1], strides = [1, 1]} : vector<16x2xf32> to vector<16x1xf32>
    %2 = vector.extract_strided_slice %0 {offsets = [0, 1], sizes = [16, 1], strides = [1, 1]} : vector<16x2xf32> to vector<16x1xf32>
    %cst = arith.constant 5.000000e-01 : f32
    %3 = vector.broadcast %cst : f32 to vector<16x1xf32>
    %4 = arith.cmpf ogt, %2, %3 : vector<16x1xf32>
    %c0_1 = arith.constant 0 : index
    %c0_2 = arith.constant 0 : index
    %5 = vector.load %arg2[%c0_1, %c0_2] : memref<3x64xf32, #tpu.memory_space<vmem>>, vector<1x64xf32>
    %6 = vector.broadcast %1 : vector<16x1xf32> to vector<16x64xf32>
    %7 = vector.broadcast %5 : vector<1x64xf32> to vector<16x64xf32>
    %8 = arith.mulf %6, %7 : vector<16x64xf32>
    %c1 = arith.constant 1 : index
    %c0_3 = arith.constant 0 : index
    %9 = vector.load %arg2[%c1, %c0_3] : memref<3x64xf32, #tpu.memory_space<vmem>>, vector<1x64xf32>
    %10 = vector.broadcast %9 : vector<1x64xf32> to vector<16x64xf32>
    %11 = arith.subf %8, %10 : vector<16x64xf32>
    %12 = math.cos %11 : vector<16x64xf32>
    %c2 = arith.constant 2 : index
    %c0_4 = arith.constant 0 : index
    %13 = vector.load %arg2[%c2, %c0_4] : memref<3x64xf32, #tpu.memory_space<vmem>>, vector<1x64xf32>
    %14 = vector.shape_cast %4 : vector<16x1xi1> to vector<16x1xi1>
    %15 = vector.broadcast %14 : vector<16x1xi1> to vector<16x64xi1>
    %16 = vector.shape_cast %13 : vector<1x64xf32> to vector<1x64xf32>
    %17 = vector.broadcast %16 : vector<1x64xf32> to vector<16x64xf32>
    %18 = arith.select %15, %17, %12 : vector<16x64xi1>, vector<16x64xf32>
    %19 = arith.truncf %18 : vector<16x64xf32> to vector<16x64xbf16>
    %c0_5 = arith.constant 0 : index
    %c0_6 = arith.constant 0 : index
    %20 = vector.load %arg3[%c0_5, %c0_6] : memref<64x128xbf16, #tpu.memory_space<vmem>>, vector<64x128xbf16>
    %cst_7 = arith.constant dense<0.000000e+00> : vector<16x128xf32>
    %21 = tpu.matmul %19, %20, %cst_7 {dimension_numbers = #tpu.dot_dimension_numbers<[1], [0], [0], [1], [0, 0, 1, 1], [], []>} : vector<16x64xbf16>, vector<64x128xbf16>, vector<16x128xf32> -> vector<16x128xf32>
    %c0_8 = arith.constant 0 : index
    %c0_9 = arith.constant 0 : index
    %22 = vector.load %arg5[%c0_8, %c0_9] : memref<2x128xf32, #tpu.memory_space<vmem>>, vector<1x128xf32>
    %23 = vector.broadcast %22 : vector<1x128xf32> to vector<16x128xf32>
    %24 = arith.addf %21, %23 : vector<16x128xf32>
    %25 = arith.negf %24 : vector<16x128xf32>
    %26 = math.exp %25 : vector<16x128xf32>
    %cst_10 = arith.constant 1.000000e+00 : f32
    %27 = vector.broadcast %cst_10 : f32 to vector<16x128xf32>
    %28 = arith.addf %27, %26 : vector<16x128xf32>
    %29 = arith.divf %27, %28 : vector<16x128xf32>
    %30 = arith.mulf %24, %29 : vector<16x128xf32>
    %31 = arith.truncf %30 : vector<16x128xf32> to vector<16x128xbf16>
    %c0_11 = arith.constant 0 : index
    %c0_12 = arith.constant 0 : index
    %32 = vector.load %arg4[%c0_11, %c0_12] : memref<128x128xbf16, #tpu.memory_space<vmem>>, vector<128x128xbf16>
    %cst_13 = arith.constant dense<0.000000e+00> : vector<16x128xf32>
    %33 = tpu.matmul %31, %32, %cst_13 {dimension_numbers = #tpu.dot_dimension_numbers<[1], [0], [0], [1], [0, 0, 1, 1], [], []>} : vector<16x128xbf16>, vector<128x128xbf16>, vector<16x128xf32> -> vector<16x128xf32>
    %c1_14 = arith.constant 1 : index
    %c0_15 = arith.constant 0 : index
    %34 = vector.load %arg5[%c1_14, %c0_15] : memref<2x128xf32, #tpu.memory_space<vmem>>, vector<1x128xf32>
    %35 = vector.broadcast %34 : vector<1x128xf32> to vector<16x128xf32>
    %36 = arith.addf %33, %35 : vector<16x128xf32>
    %c0_16 = arith.constant 0 : index
    %c0_17 = arith.constant 0 : index
    %37 = vector.load %arg6[%c0_16, %c0_17] : memref<16x128xf32, #tpu.memory_space<vmem>>, vector<16x128xf32>
    tpu.vector_store %arg6[%c0_16, %c0_17], %36 {strides = array<i32>} : memref<16x128xf32, #tpu.memory_space<vmem>>, vector<16x128xf32>,
    return
  }
  func.func @transform_0(%arg0: i32) -> (i32, i32) {
    %c0_i32 = arith.constant 0 : i32
    %c0_i32_0 = arith.constant 0 : i32
    return %arg0, %c0_i32 : i32, i32
  }
  func.func @transform_1(%arg0: i32) -> (i32, i32) {
    %c0_i32 = arith.constant 0 : i32
    %c0_i32_0 = arith.constant 0 : i32
    %c0_i32_1 = arith.constant 0 : i32
    return %c0_i32, %c0_i32_0 : i32, i32
  }
  func.func @transform_2(%arg0: i32) -> (i32, i32) {
    %c0_i32 = arith.constant 0 : i32
    %c0_i32_0 = arith.constant 0 : i32
    %c0_i32_1 = arith.constant 0 : i32
    return %c0_i32, %c0_i32_0 : i32, i32
  }
  func.func @transform_3(%arg0: i32) -> (i32, i32) {
    %c0_i32 = arith.constant 0 : i32
    %c0_i32_0 = arith.constant 0 : i32
    %c0_i32_1 = arith.constant 0 : i32
    return %c0_i32, %c0_i32_0 : i32, i32
  }
  func.func @transform_4(%arg0: i32) -> (i32, i32) {
    %c0_i32 = arith.constant 0 : i32
    %c0_i32_0 = arith.constant 0 : i32
    %c0_i32_1 = arith.constant 0 : i32
    return %c0_i32, %c0_i32_0 : i32, i32
  }
  func.func @transform_5(%arg0: i32) -> (i32, i32) {
    %c0_i32 = arith.constant 0 : i32
    %c0_i32_0 = arith.constant 0 : i32
    return %arg0, %c0_i32 : i32, i32
  }
}

</mosaic_0001>

<bundles_post_ra>
// kernel: tpu_custom_call.1
= control target key start
LH: loop header
LB: loop body
LE: loop exit
PB: predicated region body
PF: predicated region fallthrough
CT: control target
= control target key end

     0   :  { %10 = vsyncpa [#allocation3], 0  ;;  %s934_s0 = inlined_call_operand.vmem [shape: f32[16,2], index: 0, kind: input, shape index: {}]   ;;  %s935_s1 = inlined_call_operand.vmem [shape: f32[3,64], index: 1, kind: input, shape index: {}]   ;;  %s936_s2 = inlined_call_operand.hbm [shape: bf16[64,128], index: 2, kind: input, shape index: {}]   ;;  %s937_s3 = inlined_call_operand.hbm [shape: bf16[128,128], index: 3, kind: input, shape index: {}]   ;;  %s938_s4 = inlined_call_operand.vmem [shape: f32[2,128], index: 4, kind: input, shape index: {}]   ;;  %s939_s5 = inlined_call_operand.hbm [shape: f32[16,128], index: 5, kind: output, shape index: {}]  }
   0x1   :  { %11 = vsyncpa [#allocation6], 0 }
   0x2   :  { %12 = vsyncpa [#allocation4], 0  ;;  %s731_s18 = smov [#allocation2]   ;;  %s659_s22 = scalar_lea.hbm %s936_s2, 512 }
   0x3   :  { %s22_s19 = sshll.u32 %s731_s18, 4  ;;  %p660_p0 = scmp.ne.s32.totalorder %s936_s2, %s659_s22  ;;  %s23_s19 = int_to_ptr.vmem [resolvable:$true] %s22_s19 }
   0x4   :  { %p663_p1 = scmp.lt.u32.totalorder %s659_s22, %s936_s2 }
   0x6   :  { %p665_p2 = pnand %p663_p1, %p660_p0 }
   0x8   :  { %668 = shalt.err (!%p665_p2)
}
   0x9   :  { %s669_s27 = scalar_lea.vmem %s23_s19, 512  ;;  %p674_p4 = scmp.lt.s32.totalorder %s23_s19, %s23_s19 }
   0xa   :  { %p670_p3 = scmp.ne.s32.totalorder %s23_s19, %s669_s27  ;;  %p675_p5 = scmp.lt.s32.totalorder %s669_s27, %s669_s27 }
   0xc   :  { %p676_p6 = por %p675_p5, %p674_p4 }
   0xe   :  { %p677_p7 = pnand %p676_p6, %p670_p3 }
  0x10   :  { %680 = shalt.err (!%p677_p7)
}
  0x11   :  { %s732_s28 = smov 64   ;;  %s733_s29 = smov 4  }
  0x12   :  { %28 = dma.hbm_to_vmem [thread:$0]  %s936_s2, 512, %s23_s19, [#allocation3], %s732_s28, %s732_s28, %s733_s29  }
  0x13   :  { %s734_s7 = smov [#allocation5]   ;;  %s681_s11 = scalar_lea.hbm %s937_s3, 1024 }
  0x14   :  { %s34_s8 = sshll.u32 %s734_s7, 4  ;;  %p682_p8 = scmp.ne.s32.totalorder %s937_s3, %s681_s11  ;;  %s35_s8 = int_to_ptr.vmem [resolvable:$true] %s34_s8 }
  0x15   :  { %p685_p9 = scmp.lt.u32.totalorder %s681_s11, %s937_s3 }
  0x17   :  { %p687_p10 = pnand %p685_p9, %p682_p8 }
  0x19   :  { %690 = shalt.err (!%p687_p10)
}
  0x1a   :  { %s691_s16 = scalar_lea.vmem %s35_s8, 1024  ;;  %p696_p12 = scmp.lt.s32.totalorder %s35_s8, %s35_s8 }
  0x1b   :  { %p692_p11 = scmp.ne.s32.totalorder %s35_s8, %s691_s16  ;;  %p697_p13 = scmp.lt.s32.totalorder %s691_s16, %s691_s16 }
  0x1d   :  { %p698_p0 = por %p697_p13, %p696_p12 }
  0x1f   :  { %p699_p1 = pnand %p698_p0, %p692_p11 }
  0x21   :  { %702 = shalt.err (!%p699_p1)
}
  0x22   :  { %40 = dma.hbm_to_vmem [thread:$0]  %s937_s3, 1024, %s35_s8, [#allocation6], %s732_s28, %s732_s28, %s733_s29  }
  0x23   :  { %725 = dma.done.wait [#allocation3], 512  }
  0x24   :  { %726 = vsyncadd [#allocation3], 4294966784 }
  0x25   :  { %727 = dma.done.wait [#allocation6], 1024  }
  0x26   :  { %728 = vsyncadd [#allocation6], 4294966272  ;;  %v735_v0 = vmov 0   ;;  %v736_v1 = vmov 1   ;;  %v50_v2 = vld [vmem:[%s934_s0] sm:$0xff]  ;;  %v51_v3 = vld [vmem:[%s934_s0 + $0x8] sm:$0xff] }
  0x27   :  { %628 = vset.pattern.permute.xlu0 %v735_v0  ;;  %629 = vset.pattern.permute.xlu1 %v736_v1  ;;  %vm52_vm0 = vcmp.gt.f32.partialorder %v50_v2, 0.5  ;;  %vm53_vm1 = vcmp.gt.f32.partialorder %v51_v3, 0.5  ;;  %v631_v6 = vld [vmem:[#allocation2] sm:$0xff]   ;;  %v737_v7 = vmov 0.0   ;;  %v632_v8 = vld [vmem:[#allocation2 + $0x8] sm:$0xff]   ;;  %v633_v9 = vld [vmem:[#allocation2 + $0x10] sm:$0xff]  }
  0x28   :  { %57 = vperm.xlu0 %628, %v50_v2   ;;  %v285_v4 = vsel %vm52_vm0, 1, %v735_v0  ;;  %v286_v5 = vsel %vm53_vm1, 1, %v735_v0  ;;  %571 = vmatprep.subr.bf16.mxu0 %v737_v7  ;;  %v634_v10 = vld [vmem:[#allocation2 + $0x18] sm:$0xff]   ;;  %vm738_vm2 = vmmov 0   ;;  %v529_v11 = vld [vmem:[%s935_s1] ss:$0 sm:$0xff] }
  0x29   :  { %288 = vperm.xlu1 %629, %v285_v4   ;;  %583 = vmatprep.subr.bf16.mxu1 %v737_v7  ;;  %v530_v12 = vld [vmem:[%s935_s1 + $0x1] ss:$0 sm:$0xff]  ;;  %v739_v35 = vmov 683565275   ;;  %v740_v39 = vmov 2475754826  }
  0x2a   :  { %572 = vmatpush3.bf16.msra.mxu0 %v631_v6  ;;  %579 = vmatprep.mubr.msk.bf16.mxu0 %vm738_vm2, %v737_v7  ;;  %v741_v41 = vmov 2131351028   ;;  %v742_v43 = vmov 2102212464   ;;  %v743_v45 = vmov 920167782  }
  0x2b   :  { %573 = vmatprep.subr.bf16.mxu0 %v737_v7  ;;  %599 = vmatprep.mubr.msk.bf16.mxu1 %vm738_vm2, %v737_v7  ;;  %v744_v52 = vmov 1326507024   ;;  %s745_s29 = smov [#allocation7]  }
  0x2c   :  { %62 = vperm.xlu0 %628, %v51_v3   ;;  %s516_s30 = sshll.u32 %s745_s29, 4  ;;  %s517_s30 = int_to_ptr.vmem [resolvable:$true] %s516_s30 }
  0x2d   :  { %291 = vperm.xlu1 %629, %v286_v5   ;;  %s703_s6 = scalar_lea.vmem %s517_s30, 256  ;;  %p708_p3 = scmp.lt.s32.totalorder %s517_s30, %s517_s30 }
  0x2e   :  { %574 = vmatpush3.bf16.msra.mxu0 %v632_v8  ;;  %p704_p2 = scmp.ne.s32.totalorder %s517_s30, %s703_s6  ;;  %p709_p4 = scmp.lt.s32.totalorder %s703_s6, %s703_s6 }
  0x2f   :  { %575 = vmatprep.subr.bf16.mxu0 %v737_v7 }
  0x30   :  { %630 = vset.pattern.permute.xlu0 %v736_v1  ;;  %p710_p5 = por %p709_p4, %p708_p3 }
  0x32   :  { %576 = vmatpush3.bf16.msra.mxu0 %v633_v9  ;;  %p711_p6 = pnand %p710_p5, %p704_p2 }
  0x33   :  { %577 = vmatprep.subr.bf16.mxu0 %v737_v7 }
  0x36   :  { %578 = vmatpush3.bf16.msra.mxu0 %v634_v10 }
  0xa7   :  { %v58_v13 = vpop.permute.xlu0 %57 }
  0xa8   :  { %v69_v14 = vmul.f32 %v529_v11, %v58_v13 }
  0xaa   :  { %v821_v15 = vsub.f32 %v69_v14, %v530_v12 }
  0xab   :  { %v63_v16 = vpop.permute.xlu0 %62 }
  0xac   :  { %v78_v17 = vand.u32 2147483647, %v821_v15  ;;  %v81_v18 = vand.u32 2139095040, %v821_v15  ;;  %v70_v19 = vmul.f32 %v529_v11, %v63_v16  ;;  %vm80_vm1 = vcmp.lt.s32.totalorder %v821_v15, 0 }
  0xae   :  { %v82_v20 = vshrl.u32 %v81_v18, 23  ;;  %v825_v21 = vsub.f32 %v70_v19, %v530_v12  ;;  %v85_v22 = vand.u32 8388607, %v78_v17  ;;  %vm879_vm2 = vcmp.le.f32.partialorder %v78_v17, 0.7853982 }
  0xb0   :  { %v531_v23 = vadd.s32 4294967169, %v82_v20  ;;  %v184_v24 = vand.u32 2139095040, %v825_v21  ;;  %v86_v26 = vor.u32 8388608, %v85_v22  ;;  %v181_v28 = vand.u32 2147483647, %v825_v21 }
  0xb2   :  { %v88_v25 = vadd.s32 1, %v531_v23  ;;  %v185_v27 = vshrl.u32 %v184_v24, 23  ;;  %v831_v33 = vshll.u32 %v86_v26, 8  ;;  %v188_v37 = vand.u32 8388607, %v181_v28 }
  0xb4   :  { %vm89_vm3 = vcmp.gt.s32.totalorder %v88_v25, 0  ;;  %v535_v30 = vadd.s32 4294967169, %v185_v27  ;;  %v189_v3 = vor.u32 8388608, %v188_v37 }
  0xb5   :  { %v90_v29 = vsel %vm89_vm3, %v88_v25, 0  ;;  %vm183_vm3 = vcmp.lt.s32.totalorder %v825_v21, 0 }
  0xb6   :  { %v91_v31 = vshrl.u32 %v90_v29, 5  ;;  %v92_v32 = vand.u32 31, %v90_v29  ;;  %v191_v38 = vadd.s32 1, %v535_v30  ;;  %v229_v19 = vshll.u32 %v189_v3, 8 }
  0xb8   :  { %v93_v34 = vsub.s32 32, %v92_v32  ;;  %v95_v36 = vshll.u32 %v739_v35, %v92_v32  ;;  %v98_v40 = vshll.u32 %v740_v39, %v92_v32  ;;  %v101_v42 = vshll.u32 %v741_v41, %v92_v32 }
  0xb9   :  { %v104_v44 = vshll.u32 %v742_v43, %v92_v32  ;;  %v107_v46 = vshll.u32 %v743_v45, %v92_v32  ;;  %vm110_vm4 = vcmp.lt.s32.totalorder %v91_v31, 1  ;;  %vm112_vm5 = vcmp.lt.s32.totalorder %v91_v31, 3 }
  0xba   :  { %v96_v47 = vshrl.u32 %v740_v39, %v93_v34  ;;  %v99_v48 = vshrl.u32 %v741_v41, %v93_v34  ;;  %v102_v49 = vshrl.u32 %v742_v43, %v93_v34  ;;  %v94_v50 = vshrl.u32 %v739_v35, %v93_v34 }
  0xbb   :  { %v105_v51 = vshrl.u32 %v743_v45, %v93_v34  ;;  %v108_v53 = vshrl.u32 %v744_v52, %v93_v34  ;;  %vm192_vm6 = vcmp.gt.s32.totalorder %v191_v38, 0  ;;  %vm113_vm7 = vcmp.lt.s32.totalorder %v91_v31, 4 }
  0xbc   :  { %v97_v54 = vor.u32 %v96_v47, %v95_v36  ;;  %v100_v55 = vor.u32 %v99_v48, %v98_v40  ;;  %v103_v56 = vor.u32 %v102_v49, %v101_v42  ;;  %v193_v59 = vsel %vm192_vm6, %v191_v38, 0 }
  0xbd   :  { %v106_v57 = vor.u32 %v105_v51, %v104_v44  ;;  %v109_v58 = vor.u32 %v108_v53, %v107_v46  ;;  %vm111_vm8 = vcmp.lt.s32.totalorder %v91_v31, 2  ;;  %v195_v6 = vand.u32 31, %v193_v59 }
  0xbe   :  { %v114_v60 = vsel %vm110_vm4, %v94_v50, %v97_v54  ;;  %v115_v61 = vsel %vm113_vm7, %v103_v56, 2102212464  ;;  %v118_v62 = vsel %vm110_vm4, %v97_v54, %v100_v55  ;;  %v122_v63 = vsel %vm110_vm4, %v100_v55, %v103_v56 }
  0xbf   :  { %v116_v0 = vsel %vm112_vm5, %v100_v55, %v115_v61  ;;  %v119_v1 = vsel %vm113_vm7, %v106_v57, 920167782  ;;  %v123_v2 = vsel %vm113_vm7, %v109_v58, 1326507024  ;;  %v194_v16 = vshrl.u32 %v193_v59, 5 }
  0xc0   :  { %v120_v4 = vsel %vm112_vm5, %v103_v56, %v119_v1  ;;  %v124_v5 = vsel %vm112_vm5, %v106_v57, %v123_v2  ;;  %v117_v8 = vsel %vm111_vm8, %v114_v60, %v116_v0  ;;  %v196_v18 = vsub.s32 32, %v195_v6 }
  0xc1   :  { %v121_v9 = vsel %vm111_vm8, %v118_v62, %v120_v4  ;;  %v125_v10 = vsel %vm111_vm8, %v122_v63, %v124_v5  ;;  %v133_v20 = vmul.u32 %v831_v33, %v117_v8  ;;  %v198_v22 = vshll.u32 %v739_v35, %v195_v6 }
  0xc2   :  { %v844_v11 = vmul.u32.u64.low %v831_v33, %v125_v10  ;;  %v845_v12 = vmul.u32.u64.high %v831_v33, %v125_v10, %v844_v11  ;;  %v848_v13 = vmul.u32.u64.low %v831_v33, %v121_v9  ;;  %v849_v14 = vmul.u32.u64.high %v831_v33, %v121_v9, %v848_v13 }
  0xc3   :  { %v201_v23 = vshll.u32 %v740_v39, %v195_v6  ;;  %v204_v24 = vshll.u32 %v741_v41, %v195_v6  ;;  %v199_v25 = vshrl.u32 %v740_v39, %v196_v18  ;;  %v202_v26 = vshrl.u32 %v741_v41, %v196_v18 }
  0xc4   :  { %v205_v27 = vshrl.u32 %v742_v43, %v196_v18  ;;  %v207_v29 = vshll.u32 %v742_v43, %v195_v6  ;;  %vm135_vm9 = vc.u32 %v845_v12, %v848_v13  ;;  %v136_v30 = vadd.s32 1, %v849_v14 }
  0xc5   :  { %v208_v31 = vshrl.u32 %v743_v45, %v196_v18  ;;  %v210_v32 = vshll.u32 %v743_v45, %v195_v6  ;;  %v200_v34 = vor.u32 %v199_v25, %v198_v22  ;;  %v203_v36 = vor.u32 %v202_v26, %v201_v23 }
  0xc6   :  { %v206_v37 = vor.u32 %v205_v27, %v204_v24  ;;  %v211_v38 = vshrl.u32 %v744_v52, %v196_v18  ;;  %v137_v33 = vsel %vm135_vm9, %v136_v30, %v849_v14  ;;  %vm213_vm10 = vcmp.lt.s32.totalorder %v194_v16, 1 }
  0xc7   :  { %v209_v40 = vor.u32 %v208_v31, %v207_v29  ;;  %vm216_vm11 = vcmp.lt.s32.totalorder %v194_v16, 4  ;;  %v138_v39 = vadd.s32 %v137_v33, %v133_v20  ;;  %vm215_vm12 = vcmp.lt.s32.totalorder %v194_v16, 3 }
  0xc8   :  { %v212_v41 = vor.u32 %v211_v38, %v210_v32  ;;  %v218_v42 = vsel %vm216_vm11, %v206_v37, 2102212464  ;;  %v197_v43 = vshrl.u32 %v739_v35, %v196_v18  ;;  %v221_v44 = vsel %vm213_vm10, %v200_v34, %v203_v36 }
  0xc9   :  { %v222_v46 = vsel %vm216_vm11, %v209_v40, 920167782  ;;  %v225_v47 = vsel %vm213_vm10, %v203_v36, %v206_v37  ;;  %v139_v48 = vadd.s32 536870912, %v138_v39  ;;  %vm214_vm13 = vcmp.lt.s32.totalorder %v194_v16, 2 }
  0xca   :  { %v223_v45 = vsel %vm215_vm12, %v206_v37, %v222_v46  ;;  %v226_v49 = vsel %vm216_vm11, %v212_v41, 1326507024  ;;  %v217_v50 = vsel %vm213_vm10, %v197_v43, %v200_v34  ;;  %v219_v51 = vsel %vm215_vm12, %v203_v36, %v218_v42 }
  0xcb   :  { %v224_v52 = vsel %vm214_vm13, %v221_v44, %v223_v45  ;;  %v227_v53 = vsel %vm215_vm12, %v209_v40, %v226_v49  ;;  %v859_v54 = vshrl.u32 %v139_v48, 30  ;;  %v220_v60 = vsel %vm214_vm13, %v217_v50, %v219_v51 }
  0xcc   :  { %v228_v55 = vsel %vm214_vm13, %v225_v47, %v227_v53  ;;  %v861_v56 = vmul.u32.u64.low %v229_v19, %v224_v52  ;;  %v862_v57 = vmul.u32.u64.high %v229_v19, %v224_v52, %v861_v56  ;;  %v236_v63 = vmul.u32 %v229_v19, %v220_v60 }
  0xcd   :  { %v864_v58 = vmul.u32.u64.low %v229_v19, %v228_v55  ;;  %v865_v59 = vmul.u32.u64.high %v229_v19, %v228_v55, %v864_v58  ;;  %v141_v35 = vshll.u32 %v859_v54, 30  ;;  %v134_v14 = vadd.s32 %v848_v13, %v845_v12 }
  0xce   :  { %v239_v62 = vadd.s32 1, %v862_v57  ;;  %v164_v49 = vsub.s32 4, %v859_v54  ;;  %vm893_vm4 = vcmp.le.f32.partialorder %v181_v28, 0.7853982  ;;  %vm170_vm9 = vweird.f32 %v821_v15 }
  0xcf   :  { %v142_v61 = vsub.s32 %v138_v39, %v141_v35  ;;  %vm238_vm14 = vc.u32 %v865_v59, %v861_v56  ;;  %v237_v37 = vadd.s32 %v861_v56, %v865_v59  ;;  %vm273_vm13 = vweird.f32 %v825_v21 }
  0xd0   :  { %v240_v1 = vsel %vm238_vm14, %v239_v62, %v862_v57  ;;  %v165_v17 = vsel %vm80_vm1, %v164_v49, %v859_v54  ;;  %v289_v62 = vpop.permute.xlu1 %288 }
  0xd1   :  { %v144_v0 = vsub.s32 0, %v142_v61  ;;  %v241_v2 = vadd.s32 %v240_v1, %v236_v63  ;;  %v167_v58 = vsel %vm879_vm2, 0, %v165_v17  ;;  %vm293_vm11 = vcmp.eq.s32.totalorder %v289_v62, 1 }
  0xd2   :  { %v171_v35 = vand.u32 3, %v167_v58 }
  0xd3   :  { %v532_v3 = vmin.u32 %v144_v0, %v142_v61  ;;  %v242_v4 = vadd.s32 536870912, %v241_v2 }
  0xd4   :  { %vm173_vm5 = vcmp.eq.s32.totalorder %v171_v35, 0  ;;  %vm176_vm6 = vcmp.eq.s32.totalorder %v171_v35, 2  ;;  %vm172_vm7 = vcmp.lt.s32.totalorder %v171_v35, 2 }
  0xd5   :  { %v146_v5 = vclz %v532_v3  ;;  %v243_v6 = vshrl.u32 %v242_v4, 30 }
  0xd7   :  { %v533_v8 = vadd.s32 4294967294, %v146_v5  ;;  %v244_v9 = vshll.u32 %v243_v6, 30  ;;  %v267_v55 = vsub.s32 4, %v243_v6 }
  0xd9   :  { %vm534_vm15 = vcmp.lt.s32.totalorder %v533_v8, 0  ;;  %v245_v11 = vsub.s32 %v241_v2, %v244_v9  ;;  %v268_v54 = vsel %vm183_vm3, %v267_v55, %v243_v6  ;;  %v292_v9 = vpop.permute.xlu1 %291 }
  0xda   :  { %v149_v10 = vsel %vm534_vm15, 0, %v533_v8  ;;  %v270_v28 = vsel %vm893_vm4, 0, %v268_v54  ;;  %vm294_vm14 = vcmp.eq.s32.totalorder %v292_v9, 1  ;;  %vm339_vm15 = vcmask 523264  }
  0xdb   :  { %v150_v16 = vsub.s32 32, %v149_v10  ;;  %v154_v18 = vsub.s32 4294967266, %v149_v10  ;;  %v247_v19 = vsub.s32 0, %v245_v11  ;;  %v151_v20 = vshll.u32 %v142_v61, %v149_v10 }
  0xdc   :  { %v274_v1 = vand.u32 3, %v270_v28 }
  0xdd   :  { %v152_v22 = vshrl.u32 %v134_v14, %v150_v16  ;;  %v155_v23 = vadd.s32 127, %v154_v18  ;;  %v536_v24 = vmin.u32 %v247_v19, %v245_v11 }
  0xde   :  { %vm279_vm8 = vcmp.eq.s32.totalorder %v274_v1, 2  ;;  %vm276_vm10 = vcmp.eq.s32.totalorder %v274_v1, 0  ;;  %vm275_vm12 = vcmp.lt.s32.totalorder %v274_v1, 2 }
  0xdf   :  { %v153_v25 = vor.u32 %v152_v22, %v151_v20  ;;  %v156_v26 = vshll.u32 %v155_v23, 23  ;;  %v249_v27 = vclz %v536_v24  ;;  %v635_v22 = vld [vmem:[#allocation5] sm:$0xff]   ;;  %v636_v23 = vld [vmem:[#allocation5 + $0x8] sm:$0xff]   ;;  %v637_v24 = vld [vmem:[#allocation5 + $0x10] sm:$0xff]  }
  0xe0   :  { %584 = vmatpush3.bf16.msra.mxu1 %v635_v22 }
  0xe1   :  { %v157_v29 = vor.u32 4788187, %v156_v26  ;;  %v537_v30 = vadd.s32 4294967294, %v249_v27  ;;  %v160_v32 = vcvt.s32.f32 %v153_v25  ;;  %585 = vmatprep.subr.bf16.mxu1 %v737_v7  ;;  %v639_v25 = vld [vmem:[#allocation5 + $0x20] sm:$0xff]   ;;  %v640_v26 = vld [vmem:[#allocation5 + $0x28] sm:$0xff]   ;;  %v641_v27 = vld [vmem:[#allocation5 + $0x30] sm:$0xff]  }
  0xe3   :  { %v158_v31 = vand.u32 2147483647, %v157_v29  ;;  %vm538_vm0 = vcmp.lt.s32.totalorder %v537_v30, 0  ;;  %v642_v29 = vld [vmem:[#allocation5 + $0x38] sm:$0xff]  }
  0xe4   :  { %v252_v36 = vsel %vm538_vm0, 0, %v537_v30  ;;  %586 = vmatpush3.bf16.msra.mxu1 %v636_v23  ;;  %v540_v30 = vld [vmem:[%s938_s4] ss:$0 sm:$0xff] }
  0xe5   :  { %v161_v34 = vmul.f32 %v160_v32, %v158_v31  ;;  %v253_v12 = vsub.s32 32, %v252_v36  ;;  %v257_v13 = vsub.s32 4294967266, %v252_v36  ;;  %v254_v33 = vshll.u32 %v245_v11, %v252_v36  ;;  %v539_v11 = vld [vmem:[%s935_s1 + $0x2] ss:$0 sm:$0xff]  ;;  %587 = vmatprep.subr.bf16.mxu1 %v737_v7 }
  0xe7   :  { %v162_v38 = vxor.u32 2147483648, %v161_v34  ;;  %v255_v40 = vshrl.u32 %v237_v37, %v253_v12  ;;  %v258_v39 = vadd.s32 127, %v257_v13 }
  0xe8   :  { %588 = vmatpush3.bf16.msra.mxu1 %v637_v24 }
  0xe9   :  { %v163_v41 = vsel %vm80_vm1, %v162_v38, %v161_v34  ;;  %v256_v43 = vor.u32 %v255_v40, %v254_v33  ;;  %v259_v44 = vshll.u32 %v258_v39, 23  ;;  %589 = vmatprep.subr.bf16.mxu1 %v737_v7 }
  0xea   :  { %v166_v46 = vsel %vm879_vm2, %v821_v15, %v163_v41 }
  0xeb   :  { %v260_v47 = vor.u32 4788187, %v259_v44  ;;  %643 = vcosq.f32 %v166_v46  ;;  %v263_v45 = vcvt.s32.f32 %v256_v43 }
  0xec   :  { %645 = vsinq.f32 %v166_v46 }
  0xed   :  { %v261_v48 = vand.u32 2147483647, %v260_v47  ;;  %v548_v47 = vld [vmem:[%s938_s4 + $0x1] ss:$0 sm:$0xff] }
  0xef   :  { %v264_v50 = vmul.f32 %v263_v45, %v261_v48 }
  0xf1   :  { %v265_v51 = vxor.u32 2147483648, %v264_v50 }
  0xf3   :  { %v266_v52 = vsel %vm183_vm3, %v265_v51, %v264_v50 }
  0xf4   :  { %v269_v56 = vsel %vm893_vm4, %v825_v21, %v266_v52  ;;  %v638_v21 = vld [vmem:[#allocation5 + $0x18] sm:$0xff]  }
  0xf5   :  { %v644_v57 = vpop.eup %643  ;;  %647 = vcosq.f32 %v269_v56  ;;  %590 = vmatpush3.bf16.msra.mxu1 %v638_v21 }
  0xf6   :  { %v646_v59 = vpop.eup %645  ;;  %649 = vsinq.f32 %v269_v56  ;;  %v177_v61 = vxor.u32 2147483648, %v644_v57  ;;  %591 = vmatprep.subr.bf16.mxu1 %v737_v7 }
  0xf7   :  { %v174_v60 = vxor.u32 2147483648, %v646_v59 }
  0xf8   :  { %v178_v0 = vsel %vm176_vm6, %v177_v61, %v646_v59 }
  0xf9   :  { %v175_v63 = vsel %vm173_vm5, %v644_v57, %v174_v60  ;;  %592 = vmatpush3.bf16.msra.mxu1 %v639_v25 }
  0xfa   :  { %v179_v4 = vsel %vm172_vm7, %v175_v63, %v178_v0  ;;  %593 = vmatprep.subr.bf16.mxu1 %v737_v7 }
  0xfb   :  { %v180_v10 = vsel %vm170_vm9, nan, %v179_v4 }
  0xfc   :  { %v299_v19 = vsel %vm293_vm11, %v539_v11, %v180_v10 }
  0xfd   :  { %594 = vmatpush3.bf16.msra.mxu1 %v640_v26 }
  0xfe   :  { %595 = vmatprep.subr.bf16.mxu1 %v737_v7 }
  0xff   :  { %v648_v2 = vpop.eup %647 }
 0x100   :  { %v650_v3 = vpop.eup %649  ;;  %v280_v5 = vxor.u32 2147483648, %v648_v2 }
 0x101   :  { %v277_v8 = vxor.u32 2147483648, %v650_v3  ;;  %596 = vmatpush3.bf16.msra.mxu1 %v641_v27 }
 0x102   :  { %v281_v6 = vsel %vm279_vm8, %v280_v5, %v650_v3  ;;  %597 = vmatprep.subr.bf16.mxu1 %v737_v7 }
 0x103   :  { %v278_v14 = vsel %vm276_vm10, %v648_v2, %v277_v8 }
 0x104   :  { %v282_v16 = vsel %vm275_vm12, %v278_v14, %v281_v6 }
 0x105   :  { %v283_v18 = vsel %vm273_vm13, nan, %v282_v16  ;;  %598 = vmatpush3.bf16.msra.mxu1 %v642_v29 }
 0x106   :  { %v300_v20 = vsel %vm294_vm14, %v539_v11, %v283_v18 }
 0x107   :  { %v301_v15 = vpack.c.bf16 %v300_v20, %v299_v19 }
 0x109   :  { %580 = vmatmul.mubr.msk.bf16.vlgmr.msra.gmra.mrb[0].mxu0 %vm339_vm15, %v301_v15 }
 0x1dc   :  { %v377_v31 = vpop.f32.mrb[0].mxu0 }
 0x1dd   :  { %v378_v32 = vadd.f32 %v540_v30, %v377_v31  ;;  %v581_v34 = vpop.f32.mrb[1].mxu0 }
 0x1de   :  { %v380_v36 = vpop.f32.mrb[2].mxu0 }
 0x1df   :  { %v546_v37 = vmul.f32 -1.442695, %v378_v32  ;;  %v381_v12 = vadd.f32 %v540_v30, %v380_v36  ;;  %v582_v13 = vpop.f32.mrb[3].mxu0 }
 0x1e1   :  { %651 = vpow2.f32 %v546_v37  ;;  %v547_v38 = vmul.f32 -1.442695, %v381_v12 }
 0x1e3   :  { %653 = vpow2.f32 %v547_v38 }
 0x1eb   :  { %v652_v33 = vpop.eup %651 }
 0x1ec   :  { %v390_v40 = vadd.f32 1.0, %v652_v33 }
 0x1ed   :  { %v654_v39 = vpop.eup %653 }
 0x1ee   :  { %655 = vrcp.f32 %v390_v40  ;;  %v391_v7 = vadd.f32 1.0, %v654_v39 }
 0x1f0   :  { %657 = vrcp.f32 %v391_v7 }
 0x1f8   :  { %v656_v41 = vpop.eup %655 }
 0x1f9   :  { %v396_v43 = vmul.f32 %v656_v41, %v378_v32 }
 0x1fa   :  { %v658_v42 = vpop.eup %657 }
 0x1fb   :  { %v397_v44 = vmul.f32 %v658_v42, %v381_v12 }
 0x1fd   :  { %v398_v46 = vpack.c.bf16 %v397_v44, %v396_v43 }
 0x1ff   :  { %600 = vmatmul.mubr.bf16.vlgmr.msra.gmra.mrb[0].mxu1 %v398_v46 }
 0x2d2   :  { %v502_v48 = vpop.f32.mrb[0].mxu1 }
 0x2d3   :  { %v503_v45 = vadd.f32 %v548_v47, %v502_v48  ;;  %v601_v49 = vpop.f32.mrb[1].mxu1 }
 0x2d4   :  { %v505_v50 = vpop.f32.mrb[2].mxu1 }
 0x2d5   :  { %509 = vst [vmem:[#allocation7] sm:$0xff] %v503_v45  ;;  %v506_v51 = vadd.f32 %v548_v47, %v505_v50  ;;  %v602_v17 = vpop.f32.mrb[3].mxu1 }
 0x2d7   :  { %510 = vst [vmem:[#allocation7 + $0x8] sm:$0xff] %v506_v51 }
 0x2d8   :  { %714 = shalt.err (!%p711_p6)
}
 0x2d9   :  { %s715_s8 = scalar_lea.hbm %s939_s5, 256 }
 0x2da   :  { %p716_p7 = scmp.ne.s32.totalorder %s939_s5, %s715_s8  ;;  %p719_p8 = scmp.lt.u32.totalorder %s715_s8, %s939_s5 }
 0x2dc   :  { %p721_p9 = pnand %p719_p8, %p716_p7 }
 0x2de   :  { %724 = shalt.err (!%p721_p9)
}
 0x2df   :  { %s746_s13 = smov 128   ;;  %s747_s14 = smov 8  }
 0x2e0   :  { %522 = dma.vmem_to_hbm [thread:$0]  %s517_s30, 256, %s939_s5, [#allocation4], %s746_s13, %s746_s13, %s747_s14  }
 0x2e1   :  { %729 = dma.done.wait [#allocation4], 256  }
 0x2e2   :  { %730 = vsyncadd [#allocation4], 4294967040 }
 0x2e3   :  { %526 = vsyncpa [#allocation3], 1 }
 0x2e4   :  { %527 = vsyncpa [#allocation6], 1 }
 0x2e5   :  { %528 = vsyncpa [#allocation4], 1 }

</bundles_post_ra>
